<compile_context>
chip_gen: v7x
topology: tpu7x:2x2x1
jax: 0.10.0
libtpu: 0.0.40
codegen_flags: <defaults>
</compile_context>

<pallas_src>
import jax
import jax.numpy as jnp
from jax.experimental import pallas as pl
from jax.experimental.pallas import tpu as pltpu

EPS = 1e-8


def _round_up(x, m):
    return (x + m - 1) // m * m


def _gvp_kernel(s_ref, v_ref, whw_ref, wss_ref, wsv_ref, wsb_ref, wvw_ref,
                out_ref):
    tile_n = s_ref.shape[0]
    vi = v_ref.shape[2]

    # ---- fused vector hidden projection: one MXU call for all 3 components ----
    v_flat = v_ref[...].reshape(3 * tile_n, vi)                       # [3T, vi]
    vh = jnp.dot(v_flat, whw_ref[...],
                 preferred_element_type=jnp.float32)                  # [3T, h]
    vh0 = vh[0 * tile_n:1 * tile_n]                                   # [T, h] each
    vh1 = vh[1 * tile_n:2 * tile_n]
    vh2 = vh[2 * tile_n:3 * tile_n]

    # ---- vn = _norm_no_nan(vh, axis=-2): norm over the 3 spatial components ----
    vn = jnp.sqrt(jnp.maximum(vh0 * vh0 + vh1 * vh1 + vh2 * vh2, EPS))  # [T, h]

    # ---- s' = relu(Ws([s ; vn]) + b), concat-free (Ws split in the wrapper) ----
    s_lin = (jnp.dot(s_ref[...], wss_ref[...], preferred_element_type=jnp.float32)
             + jnp.dot(vn, wsv_ref[...], preferred_element_type=jnp.float32)
             + wsb_ref[...])                                          # [T, so]
    s_act = jnp.maximum(s_lin, 0.0)

    # ---- fused output vector projection (one MXU call for all 3 components) ----
    vout = jnp.dot(vh, wvw_ref[...], preferred_element_type=jnp.float32)  # [3T, vo]
    vo0 = vout[0 * tile_n:1 * tile_n]                                 # [T, vo] each
    vo1 = vout[1 * tile_n:2 * tile_n]
    vo2 = vout[2 * tile_n:3 * tile_n]

    # ---- vector_gate=False path: gate = sigmoid(||v'|| over spatial comps) ----
    vnorm = jnp.sqrt(jnp.maximum(vo0 * vo0 + vo1 * vo1 + vo2 * vo2, EPS))  # [T, vo]
    gate = jax.nn.sigmoid(vnorm)

    # ---- single lane-dense output slab: [s', v'_x, v'_y, v'_z] ----
    out_ref[...] = jnp.concatenate(
        [s_act, vo0 * gate, vo1 * gate, vo2 * gate], axis=-1)


def gvp_forward(s, v, wh_w, ws_w, ws_b, wv_w, *, tile_n=1024):
    """GVP forward.

    s: [N, si] f32, v: [N, vi, 3] f32 (PyTorch layout).
    Weights stored pre-transposed vs. nn.Linear:
      wh_w [vi, h], ws_w [si+h, so], ws_b [so], wv_w [h, vo].
    Returns (s_out [N, so], v_out [N, vo, 3]).
    """
    N, si = s.shape
    _, vi, _ = v.shape
    h = wh_w.shape[1]
    so = ws_w.shape[1]
    vo = wv_w.shape[1]

    # --- wrapper-side layout glue (plain JAX) ---
    ws_w_s = ws_w[:si]                 # [si, so] : acts on s
    ws_w_v = ws_w[si:]                 # [h,  so] : acts on vn
    ws_b2 = ws_b.reshape(1, so)
    v3 = jnp.transpose(v, (2, 0, 1))   # [3, N, vi] : spatial comps stacked on rows

    # --- pick a row tile (multiple of 8) and pad N so every block is full ---
    tile = int(min(tile_n, _round_up(N, 8)))
    tile = max(8, (tile // 8) * 8)
    n_pad = _round_up(N, tile)
    if n_pad != N:
        s = jnp.pad(s, ((0, n_pad - N), (0, 0)))
        v3 = jnp.pad(v3, ((0, 0), (0, n_pad - N), (0, 0)))

    out_w = so + 3 * vo
    grid = (n_pad // tile,)

    out = pl.pallas_call(
        _gvp_kernel,
        out_shape=jax.ShapeDtypeStruct((n_pad, out_w), jnp.float32),
        grid_spec=pltpu.PrefetchScalarGridSpec(
            num_scalar_prefetch=0,
            grid=grid,
            in_specs=[
                pl.BlockSpec((tile, si), lambda i: (i, 0)),        # s rows
                pl.BlockSpec((3, tile, vi), lambda i: (0, i, 0)),  # stacked v rows
                pl.BlockSpec((vi, h), lambda i: (0, 0)),           # Wh  (resident)
                pl.BlockSpec((si, so), lambda i: (0, 0)),          # Ws (scalar part)
                pl.BlockSpec((h, so), lambda i: (0, 0)),           # Ws (vn part)
                pl.BlockSpec((1, so), lambda i: (0, 0)),           # Ws bias
                pl.BlockSpec((h, vo), lambda i: (0, 0)),           # Wv  (resident)
            ],
            out_specs=pl.BlockSpec((tile, out_w), lambda i: (i, 0)),
        ),
        compiler_params=pltpu.CompilerParams(
            dimension_semantics=("parallel",)),
    )(s, v3, wh_w, ws_w_s, ws_w_v, ws_b2, wv_w)

    out = out[:N]
    s_out = out[:, :so]
    # packed as [comp0 | comp1 | comp2] -> [N, vo, 3] (PyTorch output layout)
    v_out = jnp.transpose(out[:, so:].reshape(N, 3, vo), (0, 2, 1))
    return s_out, v_out


def gvp_reference(s, v, wh_w, ws_w, ws_b, wv_w):
    """Pure-JAX reference mirroring the PyTorch GVP.forward exactly."""
    vt = jnp.swapaxes(v, -1, -2)                                      # [N, 3, vi]
    vh = vt @ wh_w                                                    # [N, 3, h]
    vn = jnp.sqrt(jnp.maximum(jnp.sum(vh * vh, axis=-2), EPS))        # [N, h]
    s_out = jnp.concatenate([s, vn], axis=-1) @ ws_w + ws_b           # [N, so]
    vout = vh @ wv_w                                                  # [N, 3, vo]
    vout = jnp.swapaxes(vout, -1, -2)                                 # [N, vo, 3]
    vnorm = jnp.sqrt(jnp.maximum(jnp.sum(vout * vout, axis=-1, keepdims=True), EPS))
    vout = vout * jax.nn.sigmoid(vnorm)
    s_out = jnp.maximum(s_out, 0.0)
    return s_out, vout


if __name__ == "__main__":
    # small GVP config: in_dims=(16, 8), out_dims=(16, 8), h_dim=max(8, 8)=8
    N, si, vi, so, vo = 8, 16, 8, 16, 8
    h = max(vi, vo)

    key = jax.random.PRNGKey(0)
    ks = jax.random.split(key, 6)
    s = jax.random.normal(ks[0], (N, si), dtype=jnp.float32)
    v = jax.random.normal(ks[1], (N, vi, 3), dtype=jnp.float32)

    # deterministic synthetic parameters (stored as W^T relative to nn.Linear)
    wh_w = jax.random.normal(ks[2], (vi, h), dtype=jnp.float32) * 0.2
    ws_w = jax.random.normal(ks[3], (si + h, so), dtype=jnp.float32) * 0.2
    ws_b = jax.random.normal(ks[4], (so,), dtype=jnp.float32) * 0.1
    wv_w = jax.random.normal(ks[5], (h, vo), dtype=jnp.float32) * 0.2

    # single-tile path
    s_out, v_out = gvp_forward(s, v, wh_w, ws_w, ws_b, wv_w)
    jax.block_until_ready((s_out, v_out))
    s_exp, v_exp = gvp_reference(s, v, wh_w, ws_w, ws_b, wv_w)
    assert s_out.shape == (N, so) and v_out.shape == (N, vo, 3)
    assert jnp.allclose(s_out, s_exp, atol=1e-4, rtol=1e-4)
    assert jnp.allclose(v_out, v_exp, atol=1e-4, rtol=1e-4)

    # multi-tile + remainder-padding path (grid of 4 row tiles, N % tile != 0)
    N2 = 100
    k2 = jax.random.split(jax.random.PRNGKey(0), 2)
    s2 = jax.random.normal(k2[0], (N2, si), dtype=jnp.float32)
    v2 = jax.random.normal(k2[1], (N2, vi, 3), dtype=jnp.float32)
    s_out2, v_out2 = gvp_forward(s2, v2, wh_w, ws_w, ws_b, wv_w, tile_n=32)
    jax.block_until_ready((s_out2, v_out2))
    s_exp2, v_exp2 = gvp_reference(s2, v2, wh_w, ws_w, ws_b, wv_w)
    assert jnp.allclose(s_out2, s_exp2, atol=1e-4, rtol=1e-4)
    assert jnp.allclose(v_out2, v_exp2, atol=1e-4, rtol=1e-4)

    print("KERNEL_OK")
</pallas_src>

<mosaic_0001>
module attributes {stable_mosaic.version = 11 : i64} {
  func.func @_gvp_kernel(%arg0: i32, %arg1: memref<8x16xf32, #tpu.memory_space<vmem>>, %arg2: memref<3x8x8xf32, #tpu.memory_space<vmem>>, %arg3: memref<8x8xf32, #tpu.memory_space<vmem>>, %arg4: memref<16x16xf32, #tpu.memory_space<vmem>>, %arg5: memref<8x16xf32, #tpu.memory_space<vmem>>, %arg6: memref<1x16xf32, #tpu.memory_space<vmem>>, %arg7: memref<8x8xf32, #tpu.memory_space<vmem>>, %arg8: memref<8x40xf32, #tpu.memory_space<vmem>>) attributes {dimension_semantics = [#tpu.dimension_semantics<parallel>], iteration_bounds = array<i64: 1>, scalar_prefetch = 0 : i64, scratch_operands = 0 : i64, tpu.core_type = #tpu.core_type<tc>, window_params = [{transform_indices = @transform_0, window_bounds = array<i64: 8, 16>}, {transform_indices = @transform_1, window_bounds = array<i64: 3, 8, 8>}, {pipeline_mode = #tpu.pipeline_mode<synchronous>, transform_indices = @transform_2, window_bounds = array<i64: 8, 8>}, {pipeline_mode = #tpu.pipeline_mode<synchronous>, transform_indices = @transform_3, window_bounds = array<i64: 16, 16>}, {pipeline_mode = #tpu.pipeline_mode<synchronous>, transform_indices = @transform_4, window_bounds = array<i64: 8, 16>}, {pipeline_mode = #tpu.pipeline_mode<synchronous>, transform_indices = @transform_5, window_bounds = array<i64: 1, 16>}, {pipeline_mode = #tpu.pipeline_mode<synchronous>, transform_indices = @transform_6, window_bounds = array<i64: 8, 8>}, {transform_indices = @transform_7, window_bounds = array<i64: 8, 40>}]} {
    %c0 = arith.constant 0 : index
    %c0_0 = arith.constant 0 : index
    %c0_1 = arith.constant 0 : index
    %0 = vector.load %arg2[%c0, %c0_0, %c0_1] : memref<3x8x8xf32, #tpu.memory_space<vmem>>, vector<3x8x8xf32>
    %1 = vector.shape_cast %0 : vector<3x8x8xf32> to vector<24x8xf32>
    %c0_2 = arith.constant 0 : index
    %c0_3 = arith.constant 0 : index
    %2 = vector.load %arg3[%c0_2, %c0_3] : memref<8x8xf32, #tpu.memory_space<vmem>>, vector<8x8xf32>
    %cst = arith.constant dense<0.000000e+00> : vector<24x8xf32>
    %3 = tpu.matmul %1, %2, %cst {dimension_numbers = #tpu.dot_dimension_numbers<[1], [0], [0], [1], [0, 0, 1, 1], [], []>} : vector<24x8xf32>, vector<8x8xf32>, vector<24x8xf32> -> vector<24x8xf32>
    %4 = vector.extract_strided_slice %3 {offsets = [0, 0], sizes = [8, 8], strides = [1, 1]} : vector<24x8xf32> to vector<8x8xf32>
    %5 = vector.extract_strided_slice %3 {offsets = [8, 0], sizes = [8, 8], strides = [1, 1]} : vector<24x8xf32> to vector<8x8xf32>
    %6 = vector.extract_strided_slice %3 {offsets = [16, 0], sizes = [8, 8], strides = [1, 1]} : vector<24x8xf32> to vector<8x8xf32>
    %7 = arith.mulf %4, %4 : vector<8x8xf32>
    %8 = arith.mulf %5, %5 : vector<8x8xf32>
    %9 = arith.addf %7, %8 : vector<8x8xf32>
    %10 = arith.mulf %6, %6 : vector<8x8xf32>
    %11 = arith.addf %9, %10 : vector<8x8xf32>
    %cst_4 = arith.constant 9.99999993E-9 : f32
    %12 = vector.broadcast %cst_4 : f32 to vector<8x8xf32>
    %13 = arith.maximumf %11, %12 : vector<8x8xf32>
    %14 = math.sqrt %13 : vector<8x8xf32>
    %c0_5 = arith.constant 0 : index
    %c0_6 = arith.constant 0 : index
    %15 = vector.load %arg1[%c0_5, %c0_6] : memref<8x16xf32, #tpu.memory_space<vmem>>, vector<8x16xf32>
    %c0_7 = arith.constant 0 : index
    %c0_8 = arith.constant 0 : index
    %16 = vector.load %arg4[%c0_7, %c0_8] : memref<16x16xf32, #tpu.memory_space<vmem>>, vector<16x16xf32>
    %cst_9 = arith.constant dense<0.000000e+00> : vector<8x16xf32>
    %17 = tpu.matmul %15, %16, %cst_9 {dimension_numbers = #tpu.dot_dimension_numbers<[1], [0], [0], [1], [0, 0, 1, 1], [], []>} : vector<8x16xf32>, vector<16x16xf32>, vector<8x16xf32> -> vector<8x16xf32>
    %c0_10 = arith.constant 0 : index
    %c0_11 = arith.constant 0 : index
    %18 = vector.load %arg5[%c0_10, %c0_11] : memref<8x16xf32, #tpu.memory_space<vmem>>, vector<8x16xf32>
    %cst_12 = arith.constant dense<0.000000e+00> : vector<8x16xf32>
    %19 = tpu.matmul %14, %18, %cst_12 {dimension_numbers = #tpu.dot_dimension_numbers<[1], [0], [0], [1], [0, 0, 1, 1], [], []>} : vector<8x8xf32>, vector<8x16xf32>, vector<8x16xf32> -> vector<8x16xf32>
    %20 = arith.addf %17, %19 : vector<8x16xf32>
    %c0_13 = arith.constant 0 : index
    %c0_14 = arith.constant 0 : index
    %21 = vector.load %arg6[%c0_13, %c0_14] : memref<1x16xf32, #tpu.memory_space<vmem>>, vector<1x16xf32>
    %22 = vector.broadcast %21 : vector<1x16xf32> to vector<8x16xf32>
    %23 = arith.addf %20, %22 : vector<8x16xf32>
    %cst_15 = arith.constant 0.000000e+00 : f32
    %24 = vector.broadcast %cst_15 : f32 to vector<8x16xf32>
    %25 = arith.maximumf %23, %24 : vector<8x16xf32>
    %c0_16 = arith.constant 0 : index
    %c0_17 = arith.constant 0 : index
    %26 = vector.load %arg7[%c0_16, %c0_17] : memref<8x8xf32, #tpu.memory_space<vmem>>, vector<8x8xf32>
    %cst_18 = arith.constant dense<0.000000e+00> : vector<24x8xf32>
    %27 = tpu.matmul %3, %26, %cst_18 {dimension_numbers = #tpu.dot_dimension_numbers<[1], [0], [0], [1], [0, 0, 1, 1], [], []>} : vector<24x8xf32>, vector<8x8xf32>, vector<24x8xf32> -> vector<24x8xf32>
    %28 = vector.extract_strided_slice %27 {offsets = [0, 0], sizes = [8, 8], strides = [1, 1]} : vector<24x8xf32> to vector<8x8xf32>
    %29 = vector.extract_strided_slice %27 {offsets = [8, 0], sizes = [8, 8], strides = [1, 1]} : vector<24x8xf32> to vector<8x8xf32>
    %30 = vector.extract_strided_slice %27 {offsets = [16, 0], sizes = [8, 8], strides = [1, 1]} : vector<24x8xf32> to vector<8x8xf32>
    %31 = arith.mulf %28, %28 : vector<8x8xf32>
    %32 = arith.mulf %29, %29 : vector<8x8xf32>
    %33 = arith.addf %31, %32 : vector<8x8xf32>
    %34 = arith.mulf %30, %30 : vector<8x8xf32>
    %35 = arith.addf %33, %34 : vector<8x8xf32>
    %cst_19 = arith.constant 9.99999993E-9 : f32
    %36 = vector.broadcast %cst_19 : f32 to vector<8x8xf32>
    %37 = arith.maximumf %35, %36 : vector<8x8xf32>
    %38 = math.sqrt %37 : vector<8x8xf32>
    %39 = arith.negf %38 : vector<8x8xf32>
    %40 = math.exp %39 : vector<8x8xf32>
    %cst_20 = arith.constant 1.000000e+00 : f32
    %41 = vector.broadcast %cst_20 : f32 to vector<8x8xf32>
    %42 = arith.addf %41, %40 : vector<8x8xf32>
    %43 = arith.divf %41, %42 : vector<8x8xf32>
    %44 = arith.mulf %28, %43 : vector<8x8xf32>
    %45 = arith.mulf %29, %43 : vector<8x8xf32>
    %46 = arith.mulf %30, %43 : vector<8x8xf32>
    %47 = tpu.concatenate %25, %44, %45, %46 in 1 : vector<8x16xf32>, vector<8x8xf32>, vector<8x8xf32>, vector<8x8xf32> -> vector<8x40xf32>
    %c0_21 = arith.constant 0 : index
    %c0_22 = arith.constant 0 : index
    %48 = vector.load %arg8[%c0_21, %c0_22] : memref<8x40xf32, #tpu.memory_space<vmem>>, vector<8x40xf32>
    tpu.vector_store %arg8[%c0_21, %c0_22], %47 {strides = array<i32>} : memref<8x40xf32, #tpu.memory_space<vmem>>, vector<8x40xf32>,
    return
  }
  func.func @transform_0(%arg0: i32) -> (i32, i32) {
    %c0_i32 = arith.constant 0 : i32
    %c0_i32_0 = arith.constant 0 : i32
    return %arg0, %c0_i32 : i32, i32
  }
  func.func @transform_1(%arg0: i32) -> (i32, i32, i32) {
    %c0_i32 = arith.constant 0 : i32
    %c0_i32_0 = arith.constant 0 : i32
    %c0_i32_1 = arith.constant 0 : i32
    return %c0_i32, %arg0, %c0_i32_0 : i32, i32, i32
  }
  func.func @transform_2(%arg0: i32) -> (i32, i32) {
    %c0_i32 = arith.constant 0 : i32
    %c0_i32_0 = arith.constant 0 : i32
    %c0_i32_1 = arith.constant 0 : i32
    return %c0_i32, %c0_i32_0 : i32, i32
  }
  func.func @transform_3(%arg0: i32) -> (i32, i32) {
    %c0_i32 = arith.constant 0 : i32
    %c0_i32_0 = arith.constant 0 : i32
    %c0_i32_1 = arith.constant 0 : i32
    return %c0_i32, %c0_i32_0 : i32, i32
  }
  func.func @transform_4(%arg0: i32) -> (i32, i32) {
    %c0_i32 = arith.constant 0 : i32
    %c0_i32_0 = arith.constant 0 : i32
    %c0_i32_1 = arith.constant 0 : i32
    return %c0_i32, %c0_i32_0 : i32, i32
  }
  func.func @transform_5(%arg0: i32) -> (i32, i32) {
    %c0_i32 = arith.constant 0 : i32
    %c0_i32_0 = arith.constant 0 : i32
    %c0_i32_1 = arith.constant 0 : i32
    return %c0_i32, %c0_i32_0 : i32, i32
  }
  func.func @transform_6(%arg0: i32) -> (i32, i32) {
    %c0_i32 = arith.constant 0 : i32
    %c0_i32_0 = arith.constant 0 : i32
    %c0_i32_1 = arith.constant 0 : i32
    return %c0_i32, %c0_i32_0 : i32, i32
  }
  func.func @transform_7(%arg0: i32) -> (i32, i32) {
    %c0_i32 = arith.constant 0 : i32
    %c0_i32_0 = arith.constant 0 : i32
    return %arg0, %c0_i32 : i32, i32
  }
}

</mosaic_0001>

<bundles_post_ra>
// kernel: tpu_custom_call.1
= control target key start
LH: loop header
LB: loop body
LE: loop exit
PB: predicated region body
PF: predicated region fallthrough
CT: control target
= control target key end

     0   :  { %12 = vsyncpa [#allocation3], 0  ;;  %s837_s0 = inlined_call_operand.hbm [shape: f32[8,16], index: 0, kind: input, shape index: {}]   ;;  %s838_s1 = inlined_call_operand.hbm [shape: f32[3,8,8], index: 1, kind: input, shape index: {}]   ;;  %s839_s2 = inlined_call_operand.hbm [shape: f32[8,8], index: 2, kind: input, shape index: {}]   ;;  %s840_s3 = inlined_call_operand.hbm [shape: f32[16,16], index: 3, kind: input, shape index: {}]   ;;  %s841_s4 = inlined_call_operand.vmem [shape: f32[8,16], index: 4, kind: input, shape index: {}]   ;;  %s842_s5 = inlined_call_operand.vmem [shape: f32[1,16], index: 5, kind: input, shape index: {}]   ;;  %s843_s6 = inlined_call_operand.vmem [shape: f32[8,8], index: 6, kind: input, shape index: {}]   ;;  %s844_s7 = inlined_call_operand.hbm [shape: f32[8,40], index: 7, kind: output, shape index: {}]  }
   0x1   :  { %13 = vsyncpa [#allocation6], 0 }
   0x2   :  { %14 = vsyncpa [#allocation9], 0 }
   0x3   :  { %15 = vsyncpa [#allocation4], 0  ;;  %s692_s24 = smov [#allocation5]   ;;  %s574_s28 = scalar_lea.hbm %s838_s1, 384 }
   0x4   :  { %s31_s25 = sshll.u32 %s692_s24, 4  ;;  %p575_p0 = scmp.ne.s32.totalorder %s838_s1, %s574_s28  ;;  %s32_s25 = int_to_ptr.vmem [resolvable:$true] %s31_s25 }
   0x5   :  { %p578_p1 = scmp.lt.u32.totalorder %s574_s28, %s838_s1 }
   0x7   :  { %p580_p2 = pnand %p578_p1, %p575_p0 }
   0x9   :  { %583 = shalt.err (!%p580_p2)
}
   0xa   :  { %s584_s10 = scalar_lea.vmem %s32_s25, 384  ;;  %p589_p4 = scmp.lt.s32.totalorder %s32_s25, %s32_s25 }
   0xb   :  { %p585_p3 = scmp.ne.s32.totalorder %s32_s25, %s584_s10  ;;  %p590_p5 = scmp.lt.s32.totalorder %s584_s10, %s584_s10 }
   0xd   :  { %p591_p6 = por %p590_p5, %p589_p4 }
   0xf   :  { %p592_p7 = pnand %p591_p6, %p585_p3 }
  0x11   :  { %595 = shalt.err (!%p592_p7)
}
  0x12   :  { %s693_s11 = smov 128   ;;  %s694_s12 = smov 8  }
  0x13   :  { %37 = dma.hbm_to_vmem [thread:$0]  %s838_s1, 384, %s32_s25, [#allocation6], %s693_s11, %s693_s11, %s694_s12  }
  0x14   :  { %s695_s15 = smov [#allocation2]   ;;  %s696_s17 = smov [#allocation7]  }
  0x15   :  { %s22_s16 = sshll.u32 %s695_s15, 4  ;;  %s44_s18 = sshll.u32 %s696_s17, 4  ;;  %s23_s16 = int_to_ptr.vmem [resolvable:$true] %s22_s16  ;;  %s45_s18 = int_to_ptr.vmem [resolvable:$true] %s44_s18 }
  0x16   :  { %s596_s21 = scalar_lea.hbm %s837_s0, 128 }
  0x17   :  { %p597_p8 = scmp.ne.s32.totalorder %s837_s0, %s596_s21  ;;  %p600_p9 = scmp.lt.u32.totalorder %s596_s21, %s837_s0 }
  0x19   :  { %p602_p10 = pnand %p600_p9, %p597_p8 }
  0x1b   :  { %605 = shalt.err (!%p602_p10)
}
  0x1c   :  { %s606_s1 = scalar_lea.vmem %s23_s16, 128  ;;  %p611_p12 = scmp.lt.s32.totalorder %s23_s16, %s23_s16 }
  0x1d   :  { %p607_p11 = scmp.ne.s32.totalorder %s23_s16, %s606_s1  ;;  %p612_p13 = scmp.lt.s32.totalorder %s606_s1, %s606_s1 }
  0x1f   :  { %p613_p0 = por %p612_p13, %p611_p12 }
  0x21   :  { %p614_p1 = pnand %p613_p0, %p607_p11 }
  0x23   :  { %617 = shalt.err (!%p614_p1)
}
  0x24   :  { %25 = dma.hbm_to_vmem [thread:$0]  %s837_s0, 128, %s23_s16, [#allocation3]  }
  0x25   :  { %s618_s30 = scalar_lea.hbm %s839_s2, 128 }
  0x26   :  { %p619_p2 = scmp.ne.s32.totalorder %s839_s2, %s618_s30  ;;  %p622_p3 = scmp.lt.u32.totalorder %s618_s30, %s839_s2 }
  0x28   :  { %p624_p4 = pnand %p622_p3, %p619_p2 }
  0x2a   :  { %627 = shalt.err (!%p624_p4)
}
  0x2b   :  { %s628_s14 = scalar_lea.vmem %s45_s18, 128  ;;  %p633_p6 = scmp.lt.s32.totalorder %s45_s18, %s45_s18 }
  0x2c   :  { %p629_p5 = scmp.ne.s32.totalorder %s45_s18, %s628_s14  ;;  %p634_p7 = scmp.lt.s32.totalorder %s628_s14, %s628_s14 }
  0x2e   :  { %p635_p8 = por %p634_p7, %p633_p6 }
  0x30   :  { %p636_p9 = pnand %p635_p8, %p629_p5 }
  0x32   :  { %639 = shalt.err (!%p636_p9)
}
  0x33   :  { %47 = dma.hbm_to_vmem [thread:$0]  %s839_s2, 128, %s45_s18, [#allocation6]  }
  0x34   :  { %s697_s16 = smov [#allocation8]   ;;  %s640_s21 = scalar_lea.hbm %s840_s3, 256 }
  0x35   :  { %s53_s17 = sshll.u32 %s697_s16, 4  ;;  %p641_p10 = scmp.ne.s32.totalorder %s840_s3, %s640_s21  ;;  %s54_s17 = int_to_ptr.vmem [resolvable:$true] %s53_s17 }
  0x36   :  { %p644_p11 = scmp.lt.u32.totalorder %s640_s21, %s840_s3 }
  0x38   :  { %p646_p12 = pnand %p644_p11, %p641_p10 }
  0x3a   :  { %649 = shalt.err (!%p646_p12)
}
  0x3b   :  { %s650_s1 = scalar_lea.vmem %s54_s17, 256  ;;  %p655_p0 = scmp.lt.s32.totalorder %s54_s17, %s54_s17 }
  0x3c   :  { %p651_p13 = scmp.ne.s32.totalorder %s54_s17, %s650_s1  ;;  %p656_p1 = scmp.lt.s32.totalorder %s650_s1, %s650_s1 }
  0x3e   :  { %p657_p2 = por %p656_p1, %p655_p0 }
  0x40   :  { %p658_p3 = pnand %p657_p2, %p651_p13 }
  0x42   :  { %661 = shalt.err (!%p658_p3)
}
  0x43   :  { %59 = dma.hbm_to_vmem [thread:$0]  %s840_s3, 256, %s54_s17, [#allocation9], %s693_s11, %s693_s11, %s694_s12  }
  0x44   :  { %684 = dma.done.wait [#allocation3], 128  }
  0x45   :  { %685 = vsyncadd [#allocation3], 4294967168 }
  0x46   :  { %686 = dma.done.wait [#allocation6], 512  }
  0x47   :  { %687 = vsyncadd [#allocation6], 4294966784 }
  0x48   :  { %688 = dma.done.wait [#allocation9], 256  }
  0x49   :  { %689 = vsyncadd [#allocation9], 4294967040  ;;  %v698_v0 = vmov 0.0   ;;  %vm699_vm0 = vmmov 0   ;;  %vm82_vm1 = vcmask 64512   ;;  %v81_v1 = vld [vmem:[#allocation7] sm:$0xff] }
  0x4a   :  { %516 = vmatprep.subr.mxu0 %v698_v0  ;;  %518 = vmatprep.mubr.msk.f32.mxu0 %vm699_vm0, %v698_v0  ;;  %v78_v2 = vld [vmem:[#allocation5] sm:$0xff]  ;;  %v79_v3 = vld [vmem:[#allocation5 + $0x8] sm:$0xff]  ;;  %v80_v4 = vld [vmem:[#allocation5 + $0x10] sm:$0xff]  ;;  %v700_v8 = vmov 0.0|0.0   ;;  %vm262_vm2 = vcmask 130048   ;;  %s702_s25 = smov 16  }
  0x4b   :  { %527 = vmatprep.subr.mxu1 %v698_v0  ;;  %529 = vmatprep.mubr.msk.f32.mxu1 %vm699_vm0, %v698_v0  ;;  %v186_v5 = vld [vmem:[#allocation8] sm:$0xff]  ;;  %v187_v6 = vld [vmem:[#allocation8 + $0x8] sm:$0xff]  ;;  %v188_v7 = vld [vmem:[%s841_s4] sm:$0xff]  ;;  %s703_s27 = smov 24   ;;  %vm470_vm7 = vcmask 195584   ;;  %s704_s30 = smov [#allocation10]  }
  0x4c   :  { %517 = vmatpush3.msra.mxu0 %v81_v1  ;;  %v551_v9 = vpack.c.bf16 %v187_v6, %v186_v5  ;;  %528 = vmatpush3.msra.mxu1 %v188_v7  ;;  %v185_v10 = vld [vmem:[#allocation2] sm:$0xff]  ;;  %s482_s8 = sshll.u32 %s704_s30, 4  ;;  %vm472_vm8 = vcmask 261120   ;;  %vm474_vm9 = vcmask 326656   ;;  %s483_s8 = int_to_ptr.vmem [resolvable:$true] %s482_s8 }
  0x4d   :  { %519 = vmatmul.mubr.msk.f32.vlgmr.msra.gmra.mrb[0].mxu0 %vm82_vm1, %v78_v2  ;;  %550 = vmatprep.subr.bf16.mxu0 %v700_v8  ;;  %v345_v27 = vld [vmem:[%s843_s6] sm:$0xff]  ;;  %s701_s6 = smov 32   ;;  %s662_s9 = scalar_lea.vmem %s483_s8, 128 }
  0x4e   :  { %521 = vmatprep.mubr.msk.f32.mxu0 %vm699_vm0, %v698_v0  ;;  %539 = vmatprep.subr.mxu1 %v698_v0  ;;  %v498_v58 = vld [vmem:[%s842_s5] ss:$0 sm:$0xff]  ;;  %p663_p4 = scmp.ne.s32.totalorder %s483_s8, %s662_s9  ;;  %p667_p5 = scmp.lt.s32.totalorder %s483_s8, %s483_s8 }
  0x4f   :  { %552 = vmatpush3.bf16.msra.mxu0 %v551_v9  ;;  %p668_p6 = scmp.lt.s32.totalorder %s662_s9, %s662_s9 }
  0x51   :  { %522 = vmatmul.mubr.msk.f32.gmra.mrb[2].mxu0 %vm82_vm1, %v79_v3  ;;  %p669_p7 = por %p668_p6, %p667_p5 }
  0x52   :  { %524 = vmatprep.mubr.msk.f32.mxu0 %vm699_vm0, %v698_v0 }
  0x53   :  { %p670_p8 = pnand %p669_p7, %p663_p4 }
  0x55   :  { %525 = vmatmul.mubr.msk.f32.gmra.mrb[4].mxu0 %vm82_vm1, %v80_v4 }
  0x56   :  { %536 = vmatprep.mubr.msk.f32.mxu0 %vm699_vm0, %v698_v0 }
  0x59   :  { %537 = vmatmul.mubr.msk.f32.vlgmr.msra.gmra.mrb[6].mxu0 %vm262_vm2, %v185_v10 }
 0x120   :  { %v158_v11 = vpop.f32.mrb[0].mxu0 }
 0x121   :  { %v520_v12 = vpop.f32.mrb[1].mxu0  ;;  %v172_v14 = vmul.f32 %v158_v11, %v158_v11 }
 0x124   :  { %v163_v13 = vpop.f32.mrb[2].mxu0 }
 0x125   :  { %v173_v15 = vmul.f32 %v163_v13, %v163_v13  ;;  %v523_v16 = vpop.f32.mrb[3].mxu0 }
 0x127   :  { %v174_v17 = vadd.f32 %v173_v15, %v172_v14 }
 0x128   :  { %v168_v18 = vpop.f32.mrb[4].mxu0 }
 0x129   :  { %v175_v19 = vmul.f32 %v168_v18, %v168_v18  ;;  %v526_v20 = vpop.f32.mrb[5].mxu0 }
 0x12b   :  { %v176_v21 = vadd.f32 %v175_v19, %v174_v17 }
 0x12c   :  { %v332_v29 = vpop.f32.mrb[6].mxu0 }
 0x12d   :  { %v177_v22 = vmax.f32 %v176_v21, 1e-08  ;;  %v538_v30 = vpop.f32.mrb[7].mxu0 }
 0x12f   :  { %566 = vrsqrt.f32 %v177_v22  ;;  %vm180_vm3 = vcmp.eq.f32.partialorder %v177_v22, inf  ;;  %v183_v25 = vand.u32 2147483648, %v177_v22  ;;  %vm182_vm4 = vcmp.eq.f32.partialorder %v177_v22, 0.0 }
 0x139   :  { %v567_v23 = vpop.eup %566 }
 0x13a   :  { %v179_v24 = vmul.f32 %v567_v23, %v177_v22 }
 0x13c   :  { %v181_v26 = vsel %vm180_vm3, %v177_v22, %v179_v24 }
 0x13d   :  { %v184_v28 = vsel %vm182_vm4, %v183_v25, %v181_v26 }
 0x13e   :  { %530 = vmatmul.mubr.msk.f32.vlgmr.msra.gmra.mrb[0].mxu1 %vm82_vm1, %v184_v28 }
 0x13f   :  { %540 = vmatpush3.msra.mxu1 %v345_v27  ;;  %541 = vmatprep.mubr.msk.f32.mxu1 %vm699_vm0, %v698_v0 }
 0x142   :  { %542 = vmatmul.mubr.msk.f32.vlgmr.msra.gmra.mrb[2].mxu1 %vm82_vm1, %v158_v11 }
 0x143   :  { %544 = vmatprep.mubr.msk.f32.mxu1 %vm699_vm0, %v698_v0 }
 0x146   :  { %545 = vmatmul.mubr.msk.f32.gmra.mrb[4].mxu1 %vm82_vm1, %v163_v13 }
 0x147   :  { %547 = vmatprep.mubr.msk.f32.mxu1 %vm699_vm0, %v698_v0 }
 0x14a   :  { %548 = vmatmul.mubr.msk.f32.gmra.mrb[6].mxu1 %vm82_vm1, %v168_v18 }
 0x211   :  { %v258_v31 = vpop.f32.mrb[0].mxu1 }
 0x212   :  { %v333_v32 = vadd.f32 %v332_v29, %v258_v31  ;;  %v531_v33 = vpop.f32.mrb[1].mxu1 }
 0x214   :  { %v343_v59 = vadd.f32 %v498_v58, %v333_v32 }
 0x215   :  { %v421_v34 = vpop.f32.mrb[2].mxu1 }
 0x216   :  { %v543_v35 = vpop.f32.mrb[3].mxu1  ;;  %v435_v37 = vmul.f32 %v421_v34, %v421_v34  ;;  %v344_v61 = vmax.f32 %v343_v59, 0.0 }
 0x219   :  { %v426_v36 = vpop.f32.mrb[4].mxu1 }
 0x21a   :  { %v436_v38 = vmul.f32 %v426_v36, %v426_v36  ;;  %v546_v39 = vpop.f32.mrb[5].mxu1 }
 0x21c   :  { %v437_v40 = vadd.f32 %v436_v38, %v435_v37 }
 0x21d   :  { %v431_v41 = vpop.f32.mrb[6].mxu1 }
 0x21e   :  { %v438_v42 = vmul.f32 %v431_v41, %v431_v41  ;;  %v549_v43 = vpop.f32.mrb[7].mxu1 }
 0x220   :  { %v439_v44 = vadd.f32 %v438_v42, %v437_v40 }
 0x222   :  { %v440_v45 = vmax.f32 %v439_v44, 1e-08 }
 0x224   :  { %568 = vrsqrt.f32 %v440_v45  ;;  %vm443_vm5 = vcmp.eq.f32.partialorder %v440_v45, inf  ;;  %v446_v48 = vand.u32 2147483648, %v440_v45  ;;  %vm445_vm6 = vcmp.eq.f32.partialorder %v440_v45, 0.0 }
 0x22e   :  { %v569_v46 = vpop.eup %568 }
 0x22f   :  { %v442_v47 = vmul.f32 %v569_v46, %v440_v45 }
 0x231   :  { %v444_v49 = vsel %vm443_vm5, %v440_v45, %v442_v47 }
 0x232   :  { %v447_v50 = vsel %vm445_vm6, %v446_v48, %v444_v49 }
 0x233   :  { %v502_v51 = vmul.f32 -1.442695, %v447_v50 }
 0x235   :  { %570 = vpow2.f32 %v502_v51 }
 0x23f   :  { %v571_v52 = vpop.eup %570 }
 0x240   :  { %v451_v53 = vadd.f32 1.0, %v571_v52 }
 0x242   :  { %572 = vrcp.f32 %v451_v53 }
 0x24c   :  { %v573_v54 = vpop.eup %572 }
 0x24d   :  { %v456_v55 = vmul.f32 %v573_v54, %v431_v41  ;;  %v454_v56 = vmul.f32 %v573_v54, %v421_v34  ;;  %v455_v57 = vmul.f32 %v573_v54, %v426_v36 }
 0x24f   :  { %466 = vrot.lane.b32.xlu1 %v456_v55, %s701_s6  ;;  %458 = vrot.lane.b32.xlu0 %v454_v56, %s702_s25 }
 0x253   :  { %462 = vrot.lane.b32.xlu0 %v455_v57, %s703_s27 }
 0x2c1   :  { %v459_v60 = vpop.permute.xlu0 %458  ;;  %v467_v0 = vpop.permute.xlu1 %466 }
 0x2c2   :  { %v469_v62 = vsel %vm262_vm2, %v344_v61, %v459_v60 }
 0x2c5   :  { %v463_v63 = vpop.permute.xlu0 %462 }
 0x2c6   :  { %v471_v1 = vsel %vm470_vm7, %v469_v62, %v463_v63 }
 0x2c7   :  { %v473_v2 = vsel %vm472_vm8, %v471_v1, %v467_v0 }
 0x2c8   :  { %475 = vst.msk [vmem:[#allocation10] sm:$0xff] %vm474_vm9, %v473_v2 }
 0x2c9   :  { %673 = shalt.err (!%p670_p8)
}
 0x2ca   :  { %s674_s13 = scalar_lea.hbm %s844_s7, 128 }
 0x2cb   :  { %p675_p9 = scmp.ne.s32.totalorder %s844_s7, %s674_s13  ;;  %p678_p10 = scmp.lt.u32.totalorder %s674_s13, %s844_s7 }
 0x2cd   :  { %p680_p11 = pnand %p678_p10, %p675_p9 }
 0x2cf   :  { %683 = shalt.err (!%p680_p11)
}
 0x2d0   :  { %485 = dma.vmem_to_hbm [thread:$0]  %s483_s8, 128, %s844_s7, [#allocation4]  }
 0x2d1   :  { %690 = dma.done.wait [#allocation4], 128  }
 0x2d2   :  { %691 = vsyncadd [#allocation4], 4294967168 }
 0x2d3   :  { %489 = vsyncpa [#allocation3], 1 }
 0x2d4   :  { %490 = vsyncpa [#allocation6], 1 }
 0x2d5   :  { %491 = vsyncpa [#allocation9], 1 }
 0x2d6   :  { %492 = vsyncpa [#allocation4], 1 }

</bundles_post_ra>
